<compile_context>
chip_gen: v6e
topology: v6e:2x2x1
jax: 0.10.0
libtpu: 0.0.40
codegen_flags: <defaults>
</compile_context>

<pallas_src>
import numpy as np

import jax
import jax.numpy as jnp
from jax.experimental import pallas as pl
from jax.experimental.pallas import tpu as pltpu


def _round_up(x, m):
    return (x + m - 1) // m * m


# ----------------------------------------------------------------------------
# Fused kernel: conv (structured matmul) + mixer (block-diag) + temporal mean.
# ----------------------------------------------------------------------------
def _seqnet_kernel(x_ref, g_ref, cb_ref, w1_ref, b1_ref, w2_ref, b2_ref,
                   mm_ref, o_ref):
    """x_ref : (bt, L*Cin)        flattened raw input rows (matmul dtype)
       g_ref : (L*Cin, N)         structured conv matrix, N = Cout*Tout
       cb_ref: (1, N)             conv bias broadcast over time (f32)
       w1/w2 : (NB, N, N)         kron(I_Tout, W^T) block-diagonal weights
       b1/b2 : (NB, 1, N)         tiled biases (f32)
       mm_ref: (N, Cout)          temporal-mean averaging matrix (f32)
       o_ref : (bt, Cout)         f32 output tile
    """
    cdt = g_ref.dtype  # MXU operand dtype chosen wrapper-side (f32 or bf16)

    # Conv1d: one lane-dense matmul; f32 accumulation + bias on the VPU.
    f = jnp.dot(x_ref[...], g_ref[...],
                preferred_element_type=jnp.float32) + cb_ref[...]

    # FeatureMixer on the raw .view(B*T, C) rows (encoded block-diagonally).
    for i in range(w1_ref.shape[0]):          # static unroll over mixer blocks
        h = jnp.dot(f.astype(cdt), w1_ref[i],
                    preferred_element_type=jnp.float32) + b1_ref[i]
        h = jnp.maximum(h, 0.0)                # ReLU, f32 VPU
        f = f + jnp.dot(h.astype(cdt), w2_ref[i],
                        preferred_element_type=jnp.float32) + b2_ref[i]

    # Fused temporal mean: per-row grouped average via a tiny f32 matmul.
    o_ref[...] = jnp.dot(f, mm_ref[...],
                         preferred_element_type=jnp.float32).astype(o_ref.dtype)


# ----------------------------------------------------------------------------
# One-time parameter re-layout (hoisted out of the forward path).
# ----------------------------------------------------------------------------
def prepare_params(params, seq_len, *, matmul_dtype=jnp.float32):
    """params use PyTorch layouts:
         conv_w: (Cout, Cin, w)   conv_b: (Cout,)
         w1,w2 : (NB, C, C)       b1,b2 : (NB, C)   (Linear: y = x @ W.T + b)

       Builds:
         g   (L*Cin, N)  with g[tau*Cin+i, c*Tout+t] = conv_w[c, i, tau-t]
         cb  (1, N)      conv bias repeated over time
         w1p/w2p (NB,N,N) kron(I_Tout, W^T) block-diagonal mixer weights
         b1p/b2p (NB,1,N) tiled mixer biases
         mm  (N, Cout)   kron(I_Cout, ones(Tout,1)/Tout) averaging matrix
       matmul_dtype may be jnp.bfloat16 (v6e/v7x fast path); bias/averaging
       stay f32.
    """
    conv_w = np.asarray(params["conv_w"], np.float32)   # (Cout, Cin, w)
    conv_b = np.asarray(params["conv_b"], np.float32)
    w1 = np.asarray(params["w1"], np.float32)            # (NB, C, C)
    b1 = np.asarray(params["b1"], np.float32)
    w2 = np.asarray(params["w2"], np.float32)
    b2 = np.asarray(params["b2"], np.float32)

    cout, cin, w = conv_w.shape
    L = int(seq_len)
    tout = L - w + 1
    n = cout * tout

    # Structured (block-Toeplitz) conv matrix.
    g = np.zeros((L, cin, cout, tout), np.float32)
    for k in range(w):
        for t in range(tout):
            g[t + k, :, :, t] = conv_w[:, :, k].T        # (Cin, Cout)
    g = g.reshape(L * cin, n)

    cb = np.repeat(conv_b, tout)[None, :]                # col c*Tout+t -> b[c]

    eye_t = np.eye(tout, dtype=np.float32)
    w1p = np.stack([np.kron(eye_t, w1[i].T) for i in range(w1.shape[0])])
    w2p = np.stack([np.kron(eye_t, w2[i].T) for i in range(w2.shape[0])])
    b1p = np.tile(b1, (1, tout))[:, None, :]             # (NB, 1, N)
    b2p = np.tile(b2, (1, tout))[:, None, :]

    mm = np.kron(np.eye(cout, dtype=np.float32),
                 np.full((tout, 1), 1.0 / tout, np.float32))  # (N, Cout)

    return {
        "g": jnp.asarray(g, matmul_dtype),
        "cb": jnp.asarray(cb, jnp.float32),
        "w1p": jnp.asarray(w1p, matmul_dtype),
        "b1p": jnp.asarray(b1p, jnp.float32),
        "w2p": jnp.asarray(w2p, matmul_dtype),
        "b2p": jnp.asarray(b2p, jnp.float32),
        "mm": jnp.asarray(mm, jnp.float32),
    }


# ----------------------------------------------------------------------------
# Forward pass: one fused pallas_call, grid over batch tiles.
# ----------------------------------------------------------------------------
@jax.jit
def seqnet_forward(x, prepped):
    if x.ndim < 3:
        # torch: unsqueeze(1) then permute(0,2,1)  ->  (B, L, 1)
        x = x[:, :, None]
    B, L, cin = x.shape
    g = prepped["g"]
    n = g.shape[1]
    cout = prepped["mm"].shape[1]
    assert g.shape[0] == L * cin, "prepare_params seq_len/inDims mismatch"
    assert n % cout == 0

    # Free row-major flatten of the *original* (B, L, Cin) layout (no permute,
    # no im2col copy); the MXU-operand cast is hoisted here per the review.
    xf = x.reshape(B, L * cin).astype(g.dtype)

    # Batch tile: full batch when tiny; multiple-of-8 sublane tiles with >= 2
    # grid steps for larger batches (v7x has 2 TensorCores on the "parallel"
    # axis).  Block sublane dims are either multiples of 8 or the full dim.
    if B >= 16:
        bt = min(256, _round_up(pl.cdiv(B, 2), 8))
    else:
        bt = B
    grid = (pl.cdiv(B, bt),)

    # Constant-index weight specs stay VMEM resident across grid steps.
    # (pipeline_mode=pl.Buffered(1) could shave their second buffer on v7x;
    #  left at the default since the footprint here is ~1 MiB.)
    return pl.pallas_call(
        _seqnet_kernel,
        out_shape=jax.ShapeDtypeStruct((B, cout), jnp.float32),
        grid=grid,
        in_specs=[
            pl.BlockSpec((bt, L * cin), lambda b: (b, 0)),
            pl.BlockSpec(g.shape, lambda b: (0, 0)),
            pl.BlockSpec(prepped["cb"].shape, lambda b: (0, 0)),
            pl.BlockSpec(prepped["w1p"].shape, lambda b: (0, 0, 0)),
            pl.BlockSpec(prepped["b1p"].shape, lambda b: (0, 0, 0)),
            pl.BlockSpec(prepped["w2p"].shape, lambda b: (0, 0, 0)),
            pl.BlockSpec(prepped["b2p"].shape, lambda b: (0, 0, 0)),
            pl.BlockSpec(prepped["mm"].shape, lambda b: (0, 0)),
        ],
        out_specs=pl.BlockSpec((bt, cout), lambda b: (b, 0)),
        compiler_params=pltpu.CompilerParams(
            dimension_semantics=("parallel",)),
    )(xf, prepped["g"], prepped["cb"], prepped["w1p"], prepped["b1p"],
      prepped["w2p"], prepped["b2p"], prepped["mm"])


# ----------------------------------------------------------------------------
# Pure-JAX reference mirroring the PyTorch forward exactly.
# ----------------------------------------------------------------------------
def seqnet_reference(x, params, w=5):
    if x.ndim < 3:
        x = x[:, None, :]
    x = jnp.transpose(x, (0, 2, 1)).astype(jnp.float32)       # (B, Cin, L)
    B, _, L = x.shape
    tout = L - w + 1
    cols = jnp.stack([x[:, :, k:k + tout] for k in range(w)], axis=0)  # (w,B,Cin,T)
    seqft = jnp.einsum("oik,kbit->bot", params["conv_w"], cols)
    seqft = seqft + params["conv_b"][None, :, None]            # (B, Cout, Tout)
    m = seqft.reshape(B * tout, -1)                            # torch .view(B*T, C)
    for i in range(params["w1"].shape[0]):
        h = jnp.maximum(m @ params["w1"][i].T + params["b1"][i], 0.0)
        m = m + (h @ params["w2"][i].T + params["b2"][i])
    return jnp.mean(m.reshape(B, -1, tout), axis=-1)


if __name__ == "__main__":
    B, seqL, inDims, outDims, w, num_blocks = 4, 12, 16, 32, 5, 2
    key = jax.random.PRNGKey(0)
    k = jax.random.split(key, 7)
    x = jax.random.normal(k[0], (B, seqL, inDims), jnp.float32)

    # Deterministic, PyTorch-default-style uniform init (shapes from __init__).
    sc = 1.0 / (inDims * w) ** 0.5       # Conv1d bound
    sl = 1.0 / outDims ** 0.5            # Linear bound
    params = {
        "conv_w": jax.random.uniform(k[1], (outDims, inDims, w), jnp.float32, -sc, sc),
        "conv_b": jax.random.uniform(k[2], (outDims,), jnp.float32, -sc, sc),
        "w1": jax.random.uniform(k[3], (num_blocks, outDims, outDims), jnp.float32, -sl, sl),
        "b1": jax.random.uniform(k[4], (num_blocks, outDims), jnp.float32, -sl, sl),
        "w2": jax.random.uniform(k[5], (num_blocks, outDims, outDims), jnp.float32, -sl, sl),
        "b2": jax.random.uniform(k[6], (num_blocks, outDims), jnp.float32, -sl, sl),
    }

    ref = jax.block_until_ready(seqnet_reference(x, params, w=w))

    # f32 MXU-operand path (tight tolerance).
    prepped32 = prepare_params(params, seq_len=seqL, matmul_dtype=jnp.float32)
    out32 = jax.block_until_ready(seqnet_forward(x, prepped32))
    assert out32.shape == (B, outDims), out32.shape
    err32 = float(jnp.max(jnp.abs(out32 - ref)))
    assert err32 < 1e-4, f"f32 path max err {err32}"

    # bf16 MXU-operand fast path (f32 accumulation in-kernel; looser tol).
    prepped16 = prepare_params(params, seq_len=seqL, matmul_dtype=jnp.bfloat16)
    out16 = jax.block_until_ready(seqnet_forward(x, prepped16))
    err16 = float(jnp.max(jnp.abs(out16 - ref)))
    assert err16 < 5e-2, f"bf16 path max err {err16}"

    print("KERNEL_OK")
</pallas_src>

<mosaic_0001>
module attributes {stable_mosaic.version = 11 : i64} {
  func.func @_seqnet_kernel(%arg0: i32, %arg1: memref<4x192xf32, #tpu.memory_space<vmem>>, %arg2: memref<192x256xf32, #tpu.memory_space<vmem>>, %arg3: memref<1x256xf32, #tpu.memory_space<vmem>>, %arg4: memref<2x256x256xf32, #tpu.memory_space<vmem>>, %arg5: memref<2x1x256xf32, #tpu.memory_space<vmem>>, %arg6: memref<2x256x256xf32, #tpu.memory_space<vmem>>, %arg7: memref<2x1x256xf32, #tpu.memory_space<vmem>>, %arg8: memref<256x32xf32, #tpu.memory_space<vmem>>, %arg9: memref<4x32xf32, #tpu.memory_space<vmem>>) attributes {dimension_semantics = [#tpu.dimension_semantics<parallel>], iteration_bounds = array<i64: 1>, scalar_prefetch = 0 : i64, scratch_operands = 0 : i64, tpu.core_type = #tpu.core_type<tc>, window_params = [{transform_indices = @transform_0, window_bounds = array<i64: 4, 192>}, {pipeline_mode = #tpu.pipeline_mode<synchronous>, transform_indices = @transform_1, window_bounds = array<i64: 192, 256>}, {pipeline_mode = #tpu.pipeline_mode<synchronous>, transform_indices = @transform_2, window_bounds = array<i64: 1, 256>}, {pipeline_mode = #tpu.pipeline_mode<synchronous>, transform_indices = @transform_3, window_bounds = array<i64: 2, 256, 256>}, {pipeline_mode = #tpu.pipeline_mode<synchronous>, transform_indices = @transform_4, window_bounds = array<i64: 2, 1, 256>}, {pipeline_mode = #tpu.pipeline_mode<synchronous>, transform_indices = @transform_5, window_bounds = array<i64: 2, 256, 256>}, {pipeline_mode = #tpu.pipeline_mode<synchronous>, transform_indices = @transform_6, window_bounds = array<i64: 2, 1, 256>}, {pipeline_mode = #tpu.pipeline_mode<synchronous>, transform_indices = @transform_7, window_bounds = array<i64: 256, 32>}, {transform_indices = @transform_8, window_bounds = array<i64: 4, 32>}]} {
    %c0 = arith.constant 0 : index
    %c0_0 = arith.constant 0 : index
    %0 = vector.load %arg1[%c0, %c0_0] : memref<4x192xf32, #tpu.memory_space<vmem>>, vector<4x192xf32>
    %c0_1 = arith.constant 0 : index
    %c0_2 = arith.constant 0 : index
    %1 = vector.load %arg2[%c0_1, %c0_2] : memref<192x256xf32, #tpu.memory_space<vmem>>, vector<192x256xf32>
    %cst = arith.constant dense<0.000000e+00> : vector<4x256xf32>
    %2 = tpu.matmul %0, %1, %cst {dimension_numbers = #tpu.dot_dimension_numbers<[1], [0], [0], [1], [0, 0, 1, 1], [], []>} : vector<4x192xf32>, vector<192x256xf32>, vector<4x256xf32> -> vector<4x256xf32>
    %c0_3 = arith.constant 0 : index
    %c0_4 = arith.constant 0 : index
    %3 = vector.load %arg3[%c0_3, %c0_4] : memref<1x256xf32, #tpu.memory_space<vmem>>, vector<1x256xf32>
    %4 = vector.broadcast %3 : vector<1x256xf32> to vector<4x256xf32>
    %5 = arith.addf %2, %4 : vector<4x256xf32>
    %c0_5 = arith.constant 0 : index
    %c0_6 = arith.constant 0 : index
    %c0_7 = arith.constant 0 : index
    %6 = vector.load %arg4[%c0_5, %c0_6, %c0_7] : memref<2x256x256xf32, #tpu.memory_space<vmem>>, vector<1x256x256xf32>
    %7 = vector.shape_cast %6 : vector<1x256x256xf32> to vector<256x256xf32>
    %cst_8 = arith.constant dense<0.000000e+00> : vector<4x256xf32>
    %8 = tpu.matmul %5, %7, %cst_8 {dimension_numbers = #tpu.dot_dimension_numbers<[1], [0], [0], [1], [0, 0, 1, 1], [], []>} : vector<4x256xf32>, vector<256x256xf32>, vector<4x256xf32> -> vector<4x256xf32>
    %c0_9 = arith.constant 0 : index
    %c0_10 = arith.constant 0 : index
    %c0_11 = arith.constant 0 : index
    %9 = vector.load %arg5[%c0_9, %c0_10, %c0_11] : memref<2x1x256xf32, #tpu.memory_space<vmem>>, vector<1x1x256xf32>
    %10 = vector.shape_cast %9 : vector<1x1x256xf32> to vector<1x256xf32>
    %11 = vector.broadcast %10 : vector<1x256xf32> to vector<4x256xf32>
    %12 = arith.addf %8, %11 : vector<4x256xf32>
    %cst_12 = arith.constant 0.000000e+00 : f32
    %13 = vector.broadcast %cst_12 : f32 to vector<4x256xf32>
    %14 = arith.maximumf %12, %13 : vector<4x256xf32>
    %c0_13 = arith.constant 0 : index
    %c0_14 = arith.constant 0 : index
    %c0_15 = arith.constant 0 : index
    %15 = vector.load %arg6[%c0_13, %c0_14, %c0_15] : memref<2x256x256xf32, #tpu.memory_space<vmem>>, vector<1x256x256xf32>
    %16 = vector.shape_cast %15 : vector<1x256x256xf32> to vector<256x256xf32>
    %cst_16 = arith.constant dense<0.000000e+00> : vector<4x256xf32>
    %17 = tpu.matmul %14, %16, %cst_16 {dimension_numbers = #tpu.dot_dimension_numbers<[1], [0], [0], [1], [0, 0, 1, 1], [], []>} : vector<4x256xf32>, vector<256x256xf32>, vector<4x256xf32> -> vector<4x256xf32>
    %18 = arith.addf %5, %17 : vector<4x256xf32>
    %c0_17 = arith.constant 0 : index
    %c0_18 = arith.constant 0 : index
    %c0_19 = arith.constant 0 : index
    %19 = vector.load %arg7[%c0_17, %c0_18, %c0_19] : memref<2x1x256xf32, #tpu.memory_space<vmem>>, vector<1x1x256xf32>
    %20 = vector.shape_cast %19 : vector<1x1x256xf32> to vector<1x256xf32>
    %21 = vector.broadcast %20 : vector<1x256xf32> to vector<4x256xf32>
    %22 = arith.addf %18, %21 : vector<4x256xf32>
    %c1 = arith.constant 1 : index
    %c0_20 = arith.constant 0 : index
    %c0_21 = arith.constant 0 : index
    %23 = vector.load %arg4[%c1, %c0_20, %c0_21] : memref<2x256x256xf32, #tpu.memory_space<vmem>>, vector<1x256x256xf32>
    %24 = vector.shape_cast %23 : vector<1x256x256xf32> to vector<256x256xf32>
    %cst_22 = arith.constant dense<0.000000e+00> : vector<4x256xf32>
    %25 = tpu.matmul %22, %24, %cst_22 {dimension_numbers = #tpu.dot_dimension_numbers<[1], [0], [0], [1], [0, 0, 1, 1], [], []>} : vector<4x256xf32>, vector<256x256xf32>, vector<4x256xf32> -> vector<4x256xf32>
    %c1_23 = arith.constant 1 : index
    %c0_24 = arith.constant 0 : index
    %c0_25 = arith.constant 0 : index
    %26 = vector.load %arg5[%c1_23, %c0_24, %c0_25] : memref<2x1x256xf32, #tpu.memory_space<vmem>>, vector<1x1x256xf32>
    %27 = vector.shape_cast %26 : vector<1x1x256xf32> to vector<1x256xf32>
    %28 = vector.broadcast %27 : vector<1x256xf32> to vector<4x256xf32>
    %29 = arith.addf %25, %28 : vector<4x256xf32>
    %cst_26 = arith.constant 0.000000e+00 : f32
    %30 = vector.broadcast %cst_26 : f32 to vector<4x256xf32>
    %31 = arith.maximumf %29, %30 : vector<4x256xf32>
    %c1_27 = arith.constant 1 : index
    %c0_28 = arith.constant 0 : index
    %c0_29 = arith.constant 0 : index
    %32 = vector.load %arg6[%c1_27, %c0_28, %c0_29] : memref<2x256x256xf32, #tpu.memory_space<vmem>>, vector<1x256x256xf32>
    %33 = vector.shape_cast %32 : vector<1x256x256xf32> to vector<256x256xf32>
    %cst_30 = arith.constant dense<0.000000e+00> : vector<4x256xf32>
    %34 = tpu.matmul %31, %33, %cst_30 {dimension_numbers = #tpu.dot_dimension_numbers<[1], [0], [0], [1], [0, 0, 1, 1], [], []>} : vector<4x256xf32>, vector<256x256xf32>, vector<4x256xf32> -> vector<4x256xf32>
    %35 = arith.addf %22, %34 : vector<4x256xf32>
    %c1_31 = arith.constant 1 : index
    %c0_32 = arith.constant 0 : index
    %c0_33 = arith.constant 0 : index
    %36 = vector.load %arg7[%c1_31, %c0_32, %c0_33] : memref<2x1x256xf32, #tpu.memory_space<vmem>>, vector<1x1x256xf32>
    %37 = vector.shape_cast %36 : vector<1x1x256xf32> to vector<1x256xf32>
    %38 = vector.broadcast %37 : vector<1x256xf32> to vector<4x256xf32>
    %39 = arith.addf %35, %38 : vector<4x256xf32>
    %c0_34 = arith.constant 0 : index
    %c0_35 = arith.constant 0 : index
    %40 = vector.load %arg8[%c0_34, %c0_35] : memref<256x32xf32, #tpu.memory_space<vmem>>, vector<256x32xf32>
    %cst_36 = arith.constant dense<0.000000e+00> : vector<4x32xf32>
    %41 = tpu.matmul %39, %40, %cst_36 {dimension_numbers = #tpu.dot_dimension_numbers<[1], [0], [0], [1], [0, 0, 1, 1], [], []>} : vector<4x256xf32>, vector<256x32xf32>, vector<4x32xf32> -> vector<4x32xf32>
    %c0_37 = arith.constant 0 : index
    %c0_38 = arith.constant 0 : index
    %42 = vector.load %arg9[%c0_37, %c0_38] : memref<4x32xf32, #tpu.memory_space<vmem>>, vector<4x32xf32>
    tpu.vector_store %arg9[%c0_37, %c0_38], %41 {strides = array<i32>} : memref<4x32xf32, #tpu.memory_space<vmem>>, vector<4x32xf32>,
    return
  }
  func.func @transform_0(%arg0: i32) -> (i32, i32) {
    %c0_i32 = arith.constant 0 : i32
    %c0_i32_0 = arith.constant 0 : i32
    return %arg0, %c0_i32 : i32, i32
  }
  func.func @transform_1(%arg0: i32) -> (i32, i32) {
    %c0_i32 = arith.constant 0 : i32
    %c0_i32_0 = arith.constant 0 : i32
    %c0_i32_1 = arith.constant 0 : i32
    return %c0_i32, %c0_i32_0 : i32, i32
  }
  func.func @transform_2(%arg0: i32) -> (i32, i32) {
    %c0_i32 = arith.constant 0 : i32
    %c0_i32_0 = arith.constant 0 : i32
    %c0_i32_1 = arith.constant 0 : i32
    return %c0_i32, %c0_i32_0 : i32, i32
  }
  func.func @transform_3(%arg0: i32) -> (i32, i32, i32) {
    %c0_i32 = arith.constant 0 : i32
    %c0_i32_0 = arith.constant 0 : i32
    %c0_i32_1 = arith.constant 0 : i32
    %c0_i32_2 = arith.constant 0 : i32
    return %c0_i32, %c0_i32_0, %c0_i32_1 : i32, i32, i32
  }
  func.func @transform_4(%arg0: i32) -> (i32, i32, i32) {
    %c0_i32 = arith.constant 0 : i32
    %c0_i32_0 = arith.constant 0 : i32
    %c0_i32_1 = arith.constant 0 : i32
    %c0_i32_2 = arith.constant 0 : i32
    return %c0_i32, %c0_i32_0, %c0_i32_1 : i32, i32, i32
  }
  func.func @transform_5(%arg0: i32) -> (i32, i32, i32) {
    %c0_i32 = arith.constant 0 : i32
    %c0_i32_0 = arith.constant 0 : i32
    %c0_i32_1 = arith.constant 0 : i32
    %c0_i32_2 = arith.constant 0 : i32
    return %c0_i32, %c0_i32_0, %c0_i32_1 : i32, i32, i32
  }
  func.func @transform_6(%arg0: i32) -> (i32, i32, i32) {
    %c0_i32 = arith.constant 0 : i32
    %c0_i32_0 = arith.constant 0 : i32
    %c0_i32_1 = arith.constant 0 : i32
    %c0_i32_2 = arith.constant 0 : i32
    return %c0_i32, %c0_i32_0, %c0_i32_1 : i32, i32, i32
  }
  func.func @transform_7(%arg0: i32) -> (i32, i32) {
    %c0_i32 = arith.constant 0 : i32
    %c0_i32_0 = arith.constant 0 : i32
    %c0_i32_1 = arith.constant 0 : i32
    return %c0_i32, %c0_i32_0 : i32, i32
  }
  func.func @transform_8(%arg0: i32) -> (i32, i32) {
    %c0_i32 = arith.constant 0 : i32
    %c0_i32_0 = arith.constant 0 : i32
    return %arg0, %c0_i32 : i32, i32
  }
}

</mosaic_0001>

<bundles_post_ra>
// kernel: seqnet_forward.1
= control target key start
LH: loop header
LB: loop body
LE: loop exit
PB: predicated region body
PF: predicated region fallthrough
CT: control target
= control target key end

     0   :  { %13 = vsyncpa [#allocation3], 0  ;;  %s1381_s0 = inlined_call_operand.vmem [shape: f32[4,192], index: 0, kind: input, shape index: {}]   ;;  %s1382_s1 = inlined_call_operand.vmem [shape: f32[192,256], index: 1, kind: input, shape index: {}]   ;;  %s1383_s2 = inlined_call_operand.vmem [shape: f32[1,256], index: 2, kind: input, shape index: {}]   ;;  %s1384_s3 = inlined_call_operand.hbm [shape: f32[2,256,256], index: 3, kind: input, shape index: {}]   ;;  %s1385_s4 = inlined_call_operand.vmem [shape: f32[2,1,256], index: 4, kind: input, shape index: {}]   ;;  %s1386_s5 = inlined_call_operand.hbm [shape: f32[2,256,256], index: 5, kind: input, shape index: {}]   ;;  %s1387_s6 = inlined_call_operand.vmem [shape: f32[2,1,256], index: 6, kind: input, shape index: {}]   ;;  %s1388_s7 = inlined_call_operand.vmem [shape: f32[256,32], index: 7, kind: input, shape index: {}]   ;;  %s1389_s8 = inlined_call_operand.hbm [shape: f32[4,32], index: 8, kind: output, shape index: {}]  }
   0x1   :  { %14 = vsyncpa [#allocation6], 0 }
   0x2   :  { %15 = vsyncpa [#allocation4], 0  ;;  %s1029_s27 = smov [#allocation2]  }
   0x3   :  { %s27_s28 = sshll.u32 %s1029_s27, 4  ;;  %s28_s28 = int_to_ptr.vmem [resolvable:$true] %s27_s28 }
   0x4   :  { %s971_s29 = scalar_lea.vmem %s28_s28, 16384  ;;  %p976_p1 = scmp.lt.s32.totalorder %s28_s28, %s28_s28 }
   0x5   :  { %p972_p0 = scmp.ne.s32.totalorder %s28_s28, %s971_s29  ;;  %p977_p2 = scmp.lt.s32.totalorder %s971_s29, %s971_s29 }
   0x7   :  { %p978_p3 = por %p977_p2, %p976_p1 }
   0x9   :  { %p979_p4 = pnand %p978_p3, %p972_p0 }
   0xb   :  { %982 = shalt.err (!%p979_p4)
}
   0xc   :  { %s1030_s30 = smov 256   ;;  %s1031_s9 = smov 16  }
   0xd   :  { %33 = dma.hbm_to_vmem [thread:$0]  %s1384_s3, 16384, %s28_s28, [#allocation3], %s1030_s30, %s1030_s30, %s1031_s9  }
   0xe   :  { %s1032_s12 = smov [#allocation5]  }
   0xf   :  { %s41_s13 = sshll.u32 %s1032_s12, 4  ;;  %s42_s13 = int_to_ptr.vmem [resolvable:$true] %s41_s13 }
  0x10   :  { %s991_s14 = scalar_lea.vmem %s42_s13, 16384  ;;  %p996_p6 = scmp.lt.s32.totalorder %s42_s13, %s42_s13 }
  0x11   :  { %p992_p5 = scmp.ne.s32.totalorder %s42_s13, %s991_s14  ;;  %p997_p7 = scmp.lt.s32.totalorder %s991_s14, %s991_s14 }
  0x13   :  { %p998_p8 = por %p997_p7, %p996_p6 }
  0x15   :  { %p999_p9 = pnand %p998_p8, %p992_p5 }
  0x17   :  { %1002 = shalt.err (!%p999_p9)
}
  0x18   :  { %47 = dma.hbm_to_vmem [thread:$0]  %s1386_s5, 16384, %s42_s13, [#allocation6], %s1030_s30, %s1030_s30, %s1031_s9  }
  0x19   :  { %1023 = dma.done.wait [#allocation3], 16384  }
  0x1a   :  { %1024 = vsyncadd [#allocation3], 4294950912 }
  0x1b   :  { %1025 = dma.done.wait [#allocation6], 16384  }
  0x1c   :  { %1026 = vsyncadd [#allocation6], 4294950912  ;;  %v90_v0 = vld [vmem:[%s1382_s1 + $0xf8] sm:$0xff]  ;;  %v89_v1 = vld [vmem:[%s1382_s1 + $0xf0] sm:$0xff]  ;;  %vm121_vm0 = vcmask 523264   ;;  %vm901_vm1 = vcmask 257024  }
  0x1d   :  { %v88_v2 = vld [vmem:[%s1382_s1 + $0xe8] sm:$0xff]  ;;  %124 = vmatprep.subr.mxu0 %v90_v0  ;;  %v87_v3 = vld [vmem:[%s1382_s1 + $0xe0] sm:$0xff]  ;;  %v86_v4 = vld [vmem:[%s1382_s1 + $0xd8] sm:$0xff] }
  0x1e   :  { %125 = vmatpush1.msra.mxu0 %v89_v1  ;;  %v85_v5 = vld [vmem:[%s1382_s1 + $0xd0] sm:$0xff]  ;;  %v84_v6 = vld [vmem:[%s1382_s1 + $0xc8] sm:$0xff]  ;;  %v83_v7 = vld [vmem:[%s1382_s1 + $0xc0] sm:$0xff] }
  0x1f   :  { %126 = vmatprep.subr.mxu0 %v88_v2  ;;  %v82_v8 = vld [vmem:[%s1382_s1 + $0xb8] sm:$0xff]  ;;  %v81_v9 = vld [vmem:[%s1382_s1 + $0xb0] sm:$0xff]  ;;  %v80_v10 = vld [vmem:[%s1382_s1 + $0xa8] sm:$0xff] }
  0x20   :  { %127 = vmatpush1.msra.mxu0 %v87_v3  ;;  %v79_v11 = vld [vmem:[%s1382_s1 + $0xa0] sm:$0xff]  ;;  %v78_v12 = vld [vmem:[%s1382_s1 + $0x98] sm:$0xff]  ;;  %v77_v13 = vld [vmem:[%s1382_s1 + $0x90] sm:$0xff] }
  0x21   :  { %128 = vmatprep.subr.mxu0 %v86_v4  ;;  %v76_v14 = vld [vmem:[%s1382_s1 + $0x88] sm:$0xff]  ;;  %v75_v15 = vld [vmem:[%s1382_s1 + $0x80] sm:$0xff]  ;;  %v74_v16 = vld [vmem:[%s1382_s1 + $0x78] sm:$0xff] }
  0x22   :  { %129 = vmatpush1.msra.mxu0 %v85_v5  ;;  %v73_v17 = vld [vmem:[%s1382_s1 + $0x70] sm:$0xff]  ;;  %v72_v18 = vld [vmem:[%s1382_s1 + $0x68] sm:$0xff]  ;;  %v1145_v19 = vld [vmem:[%s1381_s0] sm:$0xff] }
  0x23   :  { %130 = vmatprep.subr.mxu0 %v84_v6  ;;  %v226_v20 = vld [vmem:[#allocation2 + $0xf8] sm:$0xff]  ;;  %v225_v21 = vld [vmem:[#allocation2 + $0xf0] sm:$0xff]  ;;  %v71_v22 = vld [vmem:[%s1382_s1 + $0x60] sm:$0xff]  ;;  %v120_v23 = vcombine.high %v1145_v19, %v1145_v19 }
  0x24   :  { %131 = vmatpush1.msra.mxu0 %v83_v7  ;;  %271 = vmatprep.subr.mxu1 %v226_v20  ;;  %v224_v24 = vld [vmem:[#allocation2 + $0xe8] sm:$0xff]  ;;  %v70_v25 = vld [vmem:[%s1382_s1 + $0x58] sm:$0xff]  ;;  %v223_v26 = vld [vmem:[#allocation2 + $0xe0] sm:$0xff] }
  0x25   :  { %132 = vmatprep.subr.mxu0 %v82_v8  ;;  %272 = vmatpush1.msra.mxu1 %v225_v21  ;;  %v69_v27 = vld [vmem:[%s1382_s1 + $0x50] sm:$0xff]  ;;  %v222_v28 = vld [vmem:[#allocation2 + $0xd8] sm:$0xff]  ;;  %v68_v29 = vld [vmem:[%s1382_s1 + $0x48] sm:$0xff] }
  0x26   :  { %133 = vmatpush1.msra.mxu0 %v81_v9  ;;  %919 = vmatprep.mubr.msk.f32.mxu0 %vm121_vm0, %v120_v23  ;;  %v221_v30 = vld [vmem:[#allocation2 + $0xd0] sm:$0xff]  ;;  %v67_v31 = vld [vmem:[%s1382_s1 + $0x40] sm:$0xff]  ;;  %v220_v32 = vld [vmem:[#allocation2 + $0xc8] sm:$0xff] }
  0x27   :  { %134 = vmatprep.subr.mxu0 %v80_v10  ;;  %273 = vmatprep.subr.mxu1 %v224_v24  ;;  %v66_v33 = vld [vmem:[%s1382_s1 + $0x38] sm:$0xff]  ;;  %v219_v34 = vld [vmem:[#allocation2 + $0xc0] sm:$0xff]  ;;  %v65_v35 = vld [vmem:[%s1382_s1 + $0x30] sm:$0xff] }
  0x28   :  { %135 = vmatpush1.msra.mxu0 %v79_v11  ;;  %274 = vmatpush1.msra.mxu1 %v223_v26  ;;  %v218_v36 = vld [vmem:[#allocation2 + $0xb8] sm:$0xff]  ;;  %v64_v37 = vld [vmem:[%s1382_s1 + $0x28] sm:$0xff]  ;;  %v217_v38 = vld [vmem:[#allocation2 + $0xb0] sm:$0xff] }
  0x29   :  { %136 = vmatprep.subr.mxu0 %v78_v12  ;;  %275 = vmatprep.subr.mxu1 %v222_v28  ;;  %v63_v39 = vld [vmem:[%s1382_s1 + $0x20] sm:$0xff]  ;;  %v216_v40 = vld [vmem:[#allocation2 + $0xa8] sm:$0xff]  ;;  %v62_v41 = vld [vmem:[%s1382_s1 + $0x18] sm:$0xff] }
  0x2a   :  { %137 = vmatpush1.msra.mxu0 %v77_v13  ;;  %276 = vmatpush1.msra.mxu1 %v221_v30  ;;  %v215_v42 = vld [vmem:[#allocation2 + $0xa0] sm:$0xff]  ;;  %v61_v43 = vld [vmem:[%s1382_s1 + $0x10] sm:$0xff]  ;;  %v214_v44 = vld [vmem:[#allocation2 + $0x98] sm:$0xff] }
  0x2b   :  { %138 = vmatprep.subr.mxu0 %v76_v14  ;;  %277 = vmatprep.subr.mxu1 %v220_v32  ;;  %v60_v45 = vld [vmem:[%s1382_s1 + $0x8] sm:$0xff]  ;;  %v213_v46 = vld [vmem:[#allocation2 + $0x90] sm:$0xff]  ;;  %v59_v47 = vld [vmem:[%s1382_s1] sm:$0xff] }
  0x2c   :  { %139 = vmatpush1.msra.mxu0 %v75_v15  ;;  %278 = vmatpush1.msra.mxu1 %v219_v34  ;;  %v212_v48 = vld [vmem:[#allocation2 + $0x88] sm:$0xff]  ;;  %v106_v49 = vld [vmem:[%s1382_s1 + $0x178] sm:$0xff]  ;;  %v211_v50 = vld [vmem:[#allocation2 + $0x80] sm:$0xff] }
  0x2d   :  { %140 = vmatprep.subr.mxu0 %v74_v16  ;;  %279 = vmatprep.subr.mxu1 %v218_v36  ;;  %v105_v51 = vld [vmem:[%s1382_s1 + $0x170] sm:$0xff]  ;;  %v210_v52 = vld [vmem:[#allocation2 + $0x78] sm:$0xff]  ;;  %v104_v53 = vld [vmem:[%s1382_s1 + $0x168] sm:$0xff] }
  0x2e   :  { %141 = vmatpush1.msra.mxu0 %v73_v17  ;;  %280 = vmatpush1.msra.mxu1 %v217_v38  ;;  %v209_v54 = vld [vmem:[#allocation2 + $0x70] sm:$0xff]  ;;  %v103_v55 = vld [vmem:[%s1382_s1 + $0x160] sm:$0xff]  ;;  %v208_v56 = vld [vmem:[#allocation2 + $0x68] sm:$0xff] }
  0x2f   :  { %142 = vmatprep.subr.mxu0 %v72_v18  ;;  %281 = vmatprep.subr.mxu1 %v216_v40  ;;  %v102_v57 = vld [vmem:[%s1382_s1 + $0x158] sm:$0xff]  ;;  %v207_v58 = vld [vmem:[#allocation2 + $0x60] sm:$0xff]  ;;  %v101_v59 = vld [vmem:[%s1382_s1 + $0x150] sm:$0xff] }
  0x30   :  { %143 = vmatpush1.msra.mxu0 %v71_v22  ;;  %282 = vmatpush1.msra.mxu1 %v215_v42  ;;  %v206_v60 = vld [vmem:[#allocation2 + $0x58] sm:$0xff]  ;;  %v100_v61 = vld [vmem:[%s1382_s1 + $0x148] sm:$0xff]  ;;  %v205_v62 = vld [vmem:[#allocation2 + $0x50] sm:$0xff] }
  0x31   :  { %144 = vmatprep.subr.mxu0 %v70_v25  ;;  %283 = vmatprep.subr.mxu1 %v214_v44  ;;  %v99_v63 = vld [vmem:[%s1382_s1 + $0x140] sm:$0xff]  ;;  %v204_v0 = vld [vmem:[#allocation2 + $0x48] sm:$0xff]  ;;  %v98_v1 = vld [vmem:[%s1382_s1 + $0x138] sm:$0xff] }
  0x32   :  { %145 = vmatpush1.msra.mxu0 %v69_v27  ;;  %284 = vmatpush1.msra.mxu1 %v213_v46  ;;  %v203_v2 = vld [vmem:[#allocation2 + $0x40] sm:$0xff]  ;;  %v97_v3 = vld [vmem:[%s1382_s1 + $0x130] sm:$0xff]  ;;  %v202_v4 = vld [vmem:[#allocation2 + $0x38] sm:$0xff] }
  0x33   :  { %146 = vmatprep.subr.mxu0 %v68_v29  ;;  %285 = vmatprep.subr.mxu1 %v212_v48  ;;  %v96_v5 = vld [vmem:[%s1382_s1 + $0x128] sm:$0xff]  ;;  %v201_v6 = vld [vmem:[#allocation2 + $0x30] sm:$0xff]  ;;  %v95_v7 = vld [vmem:[%s1382_s1 + $0x120] sm:$0xff] }
  0x34   :  { %147 = vmatpush1.msra.mxu0 %v67_v31  ;;  %286 = vmatpush1.msra.mxu1 %v211_v50  ;;  %v200_v8 = vld [vmem:[#allocation2 + $0x28] sm:$0xff]  ;;  %v94_v9 = vld [vmem:[%s1382_s1 + $0x118] sm:$0xff]  ;;  %v199_v10 = vld [vmem:[#allocation2 + $0x20] sm:$0xff] }
  0x35   :  { %148 = vmatprep.subr.mxu0 %v66_v33  ;;  %287 = vmatprep.subr.mxu1 %v210_v52  ;;  %v93_v11 = vld [vmem:[%s1382_s1 + $0x110] sm:$0xff]  ;;  %v198_v12 = vld [vmem:[#allocation2 + $0x18] sm:$0xff]  ;;  %v92_v13 = vld [vmem:[%s1382_s1 + $0x108] sm:$0xff] }
  0x36   :  { %149 = vmatpush1.msra.mxu0 %v65_v35  ;;  %288 = vmatpush1.msra.mxu1 %v209_v54  ;;  %v197_v14 = vld [vmem:[#allocation2 + $0x10] sm:$0xff]  ;;  %v91_v15 = vld [vmem:[%s1382_s1 + $0x100] sm:$0xff]  ;;  %v196_v16 = vld [vmem:[#allocation2 + $0x8] sm:$0xff] }
  0x37   :  { %150 = vmatprep.subr.mxu0 %v64_v37  ;;  %289 = vmatprep.subr.mxu1 %v208_v56  ;;  %v195_v17 = vld [vmem:[#allocation2] sm:$0xff]  ;;  %v258_v18 = vld [vmem:[#allocation2 + $0x1f8] sm:$0xff]  ;;  %v257_v20 = vld [vmem:[#allocation2 + $0x1f0] sm:$0xff] }
  0x38   :  { %151 = vmatpush1.msra.mxu0 %v63_v39  ;;  %290 = vmatpush1.msra.mxu1 %v207_v58  ;;  %v256_v21 = vld [vmem:[#allocation2 + $0x1e8] sm:$0xff]  ;;  %v255_v22 = vld [vmem:[#allocation2 + $0x1e0] sm:$0xff]  ;;  %v254_v23 = vld [vmem:[#allocation2 + $0x1d8] sm:$0xff] }
  0x39   :  { %152 = vmatprep.subr.mxu0 %v62_v41  ;;  %291 = vmatprep.subr.mxu1 %v206_v60  ;;  %v253_v24 = vld [vmem:[#allocation2 + $0x1d0] sm:$0xff]  ;;  %v252_v25 = vld [vmem:[#allocation2 + $0x1c8] sm:$0xff]  ;;  %v251_v26 = vld [vmem:[#allocation2 + $0x1c0] sm:$0xff] }
  0x3a   :  { %153 = vmatpush1.msra.mxu0 %v61_v43  ;;  %292 = vmatpush1.msra.mxu1 %v205_v62  ;;  %v250_v27 = vld [vmem:[#allocation2 + $0x1b8] sm:$0xff]  ;;  %v249_v28 = vld [vmem:[#allocation2 + $0x1b0] sm:$0xff]  ;;  %v248_v29 = vld [vmem:[#allocation2 + $0x1a8] sm:$0xff] }
  0x3b   :  { %154 = vmatprep.subr.mxu0 %v60_v45  ;;  %293 = vmatprep.subr.mxu1 %v204_v0  ;;  %v246_v30 = vld [vmem:[#allocation2 + $0x198] sm:$0xff]  ;;  %v245_v31 = vld [vmem:[#allocation2 + $0x190] sm:$0xff]  ;;  %v244_v32 = vld [vmem:[#allocation2 + $0x188] sm:$0xff] }
  0x3c   :  { %155 = vmatpush1.msra.mxu0 %v59_v47  ;;  %294 = vmatpush1.msra.mxu1 %v203_v2  ;;  %v243_v33 = vld [vmem:[#allocation2 + $0x180] sm:$0xff]  ;;  %v242_v34 = vld [vmem:[#allocation2 + $0x178] sm:$0xff]  ;;  %v241_v35 = vld [vmem:[#allocation2 + $0x170] sm:$0xff] }
  0x3d   :  { %172 = vmatprep.subr.mxu0 %v106_v49  ;;  %295 = vmatprep.subr.mxu1 %v202_v4  ;;  %v240_v36 = vld [vmem:[#allocation2 + $0x168] sm:$0xff]  ;;  %v239_v37 = vld [vmem:[#allocation2 + $0x160] sm:$0xff]  ;;  %v238_v38 = vld [vmem:[#allocation2 + $0x158] sm:$0xff] }
  0x3e   :  { %173 = vmatpush2.msra.mxu0 %v105_v51  ;;  %296 = vmatpush1.msra.mxu1 %v201_v6  ;;  %v237_v39 = vld [vmem:[#allocation2 + $0x150] sm:$0xff]  ;;  %v236_v40 = vld [vmem:[#allocation2 + $0x148] sm:$0xff]  ;;  %v235_v41 = vld [vmem:[#allocation2 + $0x140] sm:$0xff] }
  0x3f   :  { %174 = vmatprep.subr.mxu0 %v104_v53  ;;  %297 = vmatprep.subr.mxu1 %v200_v8  ;;  %v234_v42 = vld [vmem:[#allocation2 + $0x138] sm:$0xff]  ;;  %v233_v43 = vld [vmem:[#allocation2 + $0x130] sm:$0xff]  ;;  %v232_v44 = vld [vmem:[#allocation2 + $0x128] sm:$0xff] }
  0x40   :  { %175 = vmatpush2.msra.mxu0 %v103_v55  ;;  %298 = vmatpush1.msra.mxu1 %v199_v10  ;;  %v231_v45 = vld [vmem:[#allocation2 + $0x120] sm:$0xff]  ;;  %v230_v46 = vld [vmem:[#allocation2 + $0x118] sm:$0xff]  ;;  %v229_v47 = vld [vmem:[#allocation2 + $0x110] sm:$0xff] }
  0x41   :  { %176 = vmatprep.subr.mxu0 %v102_v57  ;;  %299 = vmatprep.subr.mxu1 %v198_v12  ;;  %v228_v48 = vld [vmem:[#allocation2 + $0x108] sm:$0xff]  ;;  %v227_v49 = vld [vmem:[#allocation2 + $0x100] sm:$0xff]  ;;  %v375_v50 = vld [vmem:[#allocation5 + $0xf8] sm:$0xff] }
  0x42   :  { %177 = vmatpush2.msra.mxu0 %v101_v59  ;;  %300 = vmatpush1.msra.mxu1 %v197_v14  ;;  %v374_v51 = vld [vmem:[#allocation5 + $0xf0] sm:$0xff]  ;;  %v373_v52 = vld [vmem:[#allocation5 + $0xe8] sm:$0xff]  ;;  %v372_v53 = vld [vmem:[#allocation5 + $0xe0] sm:$0xff] }
  0x43   :  { %178 = vmatprep.subr.mxu0 %v100_v61  ;;  %301 = vmatprep.subr.mxu1 %v196_v16  ;;  %v371_v54 = vld [vmem:[#allocation5 + $0xd8] sm:$0xff]  ;;  %v370_v55 = vld [vmem:[#allocation5 + $0xd0] sm:$0xff]  ;;  %v369_v56 = vld [vmem:[#allocation5 + $0xc8] sm:$0xff] }
  0x44   :  { %179 = vmatpush2.msra.mxu0 %v99_v63  ;;  %302 = vmatpush1.msra.mxu1 %v195_v17  ;;  %v368_v57 = vld [vmem:[#allocation5 + $0xc0] sm:$0xff]  ;;  %v367_v58 = vld [vmem:[#allocation5 + $0xb8] sm:$0xff]  ;;  %v366_v59 = vld [vmem:[#allocation5 + $0xb0] sm:$0xff] }
  0x45   :  { %180 = vmatprep.subr.mxu0 %v98_v1  ;;  %303 = vmatprep.subr.mxu1 %v258_v18  ;;  %v365_v60 = vld [vmem:[#allocation5 + $0xa8] sm:$0xff]  ;;  %v364_v61 = vld [vmem:[#allocation5 + $0xa0] sm:$0xff]  ;;  %v363_v62 = vld [vmem:[#allocation5 + $0x98] sm:$0xff] }
  0x46   :  { %181 = vmatpush2.msra.mxu0 %v97_v3  ;;  %304 = vmatpush2.msra.mxu1 %v257_v20  ;;  %v362_v63 = vld [vmem:[#allocation5 + $0x90] sm:$0xff]  ;;  %v361_v0 = vld [vmem:[#allocation5 + $0x88] sm:$0xff]  ;;  %v360_v1 = vld [vmem:[#allocation5 + $0x80] sm:$0xff] }
  0x47   :  { %182 = vmatprep.subr.mxu0 %v96_v5  ;;  %305 = vmatprep.subr.mxu1 %v256_v21  ;;  %v359_v2 = vld [vmem:[#allocation5 + $0x78] sm:$0xff]  ;;  %v358_v3 = vld [vmem:[#allocation5 + $0x70] sm:$0xff]  ;;  %v357_v4 = vld [vmem:[#allocation5 + $0x68] sm:$0xff] }
  0x48   :  { %183 = vmatpush2.msra.mxu0 %v95_v7  ;;  %306 = vmatpush2.msra.mxu1 %v255_v22  ;;  %v356_v5 = vld [vmem:[#allocation5 + $0x60] sm:$0xff]  ;;  %v355_v6 = vld [vmem:[#allocation5 + $0x58] sm:$0xff]  ;;  %v354_v7 = vld [vmem:[#allocation5 + $0x50] sm:$0xff] }
  0x49   :  { %184 = vmatprep.subr.mxu0 %v94_v9  ;;  %307 = vmatprep.subr.mxu1 %v254_v23  ;;  %v353_v8 = vld [vmem:[#allocation5 + $0x48] sm:$0xff]  ;;  %v352_v9 = vld [vmem:[#allocation5 + $0x40] sm:$0xff]  ;;  %v351_v10 = vld [vmem:[#allocation5 + $0x38] sm:$0xff] }
  0x4a   :  { %185 = vmatpush2.msra.mxu0 %v93_v11  ;;  %308 = vmatpush2.msra.mxu1 %v253_v24  ;;  %v350_v11 = vld [vmem:[#allocation5 + $0x30] sm:$0xff]  ;;  %v349_v12 = vld [vmem:[#allocation5 + $0x28] sm:$0xff]  ;;  %v347_v14 = vld [vmem:[#allocation5 + $0x18] sm:$0xff] }
  0x4b   :  { %186 = vmatprep.subr.mxu0 %v92_v13  ;;  %309 = vmatprep.subr.mxu1 %v252_v25  ;;  %v348_v13 = vld [vmem:[#allocation5 + $0x20] sm:$0xff]  ;;  %v345_v16 = vld [vmem:[#allocation5 + $0x8] sm:$0xff]  ;;  %v407_v18 = vld [vmem:[#allocation5 + $0x1f8] sm:$0xff] }
  0x4c   :  { %187 = vmatpush2.msra.mxu0 %v91_v15  ;;  %310 = vmatpush2.msra.mxu1 %v251_v26  ;;  %v346_v15 = vld [vmem:[#allocation5 + $0x10] sm:$0xff]  ;;  %v344_v17 = vld [vmem:[#allocation5] sm:$0xff]  ;;  %v405_v21 = vld [vmem:[#allocation5 + $0x1e8] sm:$0xff] }
  0x4d   :  { %189 = vmatmul.mubr.f32.vlgmr.msra.gmra.mxu0 %v1145_v19  ;;  %311 = vmatprep.subr.mxu1 %v250_v27  ;;  %v247_v19 = vld [vmem:[#allocation2 + $0x1a0] sm:$0xff]  ;;  %v406_v20 = vld [vmem:[#allocation5 + $0x1f0] sm:$0xff]  ;;  %v403_v23 = vld [vmem:[#allocation5 + $0x1d8] sm:$0xff] }
  0x4e   :  { %312 = vmatpush2.msra.mxu1 %v249_v28  ;;  %408 = vmatprep.subr.mxu0 %v375_v50  ;;  %v404_v22 = vld [vmem:[#allocation5 + $0x1e0] sm:$0xff]  ;;  %v402_v24 = vld [vmem:[#allocation5 + $0x1d0] sm:$0xff]  ;;  %v401_v25 = vld [vmem:[#allocation5 + $0x1c8] sm:$0xff] }
  0x4f   :  { %313 = vmatprep.subr.mxu1 %v248_v29  ;;  %409 = vmatpush1.msra.mxu0 %v374_v51  ;;  %v400_v26 = vld [vmem:[#allocation5 + $0x1c0] sm:$0xff]  ;;  %v399_v27 = vld [vmem:[#allocation5 + $0x1b8] sm:$0xff]  ;;  %v398_v28 = vld [vmem:[#allocation5 + $0x1b0] sm:$0xff] }
  0x50   :  { %314 = vmatpush2.msra.mxu1 %v247_v19  ;;  %410 = vmatprep.subr.mxu0 %v373_v52  ;;  %v397_v29 = vld [vmem:[#allocation5 + $0x1a8] sm:$0xff]  ;;  %v396_v19 = vld [vmem:[#allocation5 + $0x1a0] sm:$0xff] }
  0x51   :  { %315 = vmatprep.subr.mxu1 %v246_v30  ;;  %411 = vmatpush1.msra.mxu0 %v372_v53  ;;  %v395_v30 = vld [vmem:[#allocation5 + $0x198] sm:$0xff] }
  0x52   :  { %316 = vmatpush2.msra.mxu1 %v245_v31  ;;  %412 = vmatprep.subr.mxu0 %v371_v54  ;;  %v394_v31 = vld [vmem:[#allocation5 + $0x190] sm:$0xff]  ;;  %v383_v53 = vld [vmem:[#allocation5 + $0x138] sm:$0xff] }
  0x53   :  { %317 = vmatprep.subr.mxu1 %v244_v32  ;;  %413 = vmatpush1.msra.mxu0 %v370_v55  ;;  %v393_v32 = vld [vmem:[#allocation5 + $0x188] sm:$0xff]  ;;  %v382_v54 = vld [vmem:[#allocation5 + $0x130] sm:$0xff] }
  0x54   :  { %318 = vmatpush2.msra.mxu1 %v243_v33  ;;  %414 = vmatprep.subr.mxu0 %v369_v56  ;;  %v392_v33 = vld [vmem:[#allocation5 + $0x180] sm:$0xff]  ;;  %v381_v55 = vld [vmem:[#allocation5 + $0x128] sm:$0xff] }
  0x55   :  { %319 = vmatprep.subr.mxu1 %v242_v34  ;;  %415 = vmatpush1.msra.mxu0 %v368_v57  ;;  %v391_v34 = vld [vmem:[#allocation5 + $0x178] sm:$0xff]  ;;  %v380_v56 = vld [vmem:[#allocation5 + $0x120] sm:$0xff] }
  0x56   :  { %320 = vmatpush2.msra.mxu1 %v241_v35  ;;  %416 = vmatprep.subr.mxu0 %v367_v58  ;;  %v390_v35 = vld [vmem:[#allocation5 + $0x170] sm:$0xff]  ;;  %v379_v57 = vld [vmem:[#allocation5 + $0x118] sm:$0xff] }
  0x57   :  { %321 = vmatprep.subr.mxu1 %v240_v36  ;;  %417 = vmatpush1.msra.mxu0 %v366_v59  ;;  %v389_v36 = vld [vmem:[#allocation5 + $0x168] sm:$0xff]  ;;  %v378_v58 = vld [vmem:[#allocation5 + $0x110] sm:$0xff] }
  0x58   :  { %322 = vmatpush2.msra.mxu1 %v239_v37  ;;  %418 = vmatprep.subr.mxu0 %v365_v60  ;;  %v388_v37 = vld [vmem:[#allocation5 + $0x160] sm:$0xff]  ;;  %v377_v59 = vld [vmem:[#allocation5 + $0x108] sm:$0xff] }
  0x59   :  { %323 = vmatprep.subr.mxu1 %v238_v38  ;;  %419 = vmatpush1.msra.mxu0 %v364_v61  ;;  %v387_v38 = vld [vmem:[#allocation5 + $0x158] sm:$0xff]  ;;  %v376_v60 = vld [vmem:[#allocation5 + $0x100] sm:$0xff] }
  0x5a   :  { %324 = vmatpush2.msra.mxu1 %v237_v39  ;;  %420 = vmatprep.subr.mxu0 %v363_v62  ;;  %v386_v39 = vld [vmem:[#allocation5 + $0x150] sm:$0xff]  ;;  %v527_v61 = vld [vmem:[#allocation2 + $0x2f8] sm:$0xff] }
  0x5b   :  { %325 = vmatprep.subr.mxu1 %v236_v40  ;;  %421 = vmatpush1.msra.mxu0 %v362_v63  ;;  %v385_v40 = vld [vmem:[#allocation5 + $0x148] sm:$0xff]  ;;  %v526_v62 = vld [vmem:[#allocation2 + $0x2f0] sm:$0xff] }
  0x5c   :  { %326 = vmatpush2.msra.mxu1 %v235_v41  ;;  %422 = vmatprep.subr.mxu0 %v361_v0  ;;  %v384_v41 = vld [vmem:[#allocation5 + $0x140] sm:$0xff]  ;;  %v525_v63 = vld [vmem:[#allocation2 + $0x2e8] sm:$0xff] }
  0x5d   :  { %327 = vmatprep.subr.mxu1 %v234_v42  ;;  %423 = vmatpush1.msra.mxu0 %v360_v1  ;;  %v109_v42 = vlaneseq  ;;  %v524_v0 = vld [vmem:[#allocation2 + $0x2e0] sm:$0xff]  ;;  %v523_v1 = vld [vmem:[#allocation2 + $0x2d8] sm:$0xff] }
  0x5e   :  { %328 = vmatpush2.msra.mxu1 %v233_v43  ;;  %424 = vmatprep.subr.mxu0 %v359_v2  ;;  %v522_v2 = vld [vmem:[#allocation2 + $0x2d0] sm:$0xff] }
  0x5f   :  { %329 = vmatprep.subr.mxu1 %v232_v44  ;;  %425 = vmatpush1.msra.mxu0 %v358_v3  ;;  %v110_v43 = vshrl.u32 %v109_v42, 7  ;;  %v521_v3 = vld [vmem:[#allocation2 + $0x2c8] sm:$0xff]  ;;  %v546_v42 = vld [vmem:[#allocation2 + $0x390] sm:$0xff] }
  0x60   :  { %330 = vmatpush2.msra.mxu1 %v231_v45  ;;  %426 = vmatprep.subr.mxu0 %v357_v4  ;;  %v520_v4 = vld [vmem:[#allocation2 + $0x2c0] sm:$0xff] }
  0x61   :  { %331 = vmatprep.subr.mxu1 %v230_v46  ;;  %427 = vmatpush1.msra.mxu0 %v356_v5  ;;  %v1237_v44 = vsub.s32 1, %v110_v43  ;;  %v1239_v45 = vsub.s32 0, %v110_v43  ;;  %v107_v46 = vld [vmem:[%s1383_s2] sm:$0x3]  ;;  %v519_v5 = vld [vmem:[#allocation2 + $0x2b8] sm:$0xff]  ;;  %v545_v43 = vld [vmem:[#allocation2 + $0x388] sm:$0xff] }
  0x62   :  { %332 = vmatpush2.msra.mxu1 %v229_v47  ;;  %428 = vmatprep.subr.mxu0 %v355_v6  ;;  %v518_v6 = vld [vmem:[#allocation2 + $0x2b0] sm:$0xff] }
  0x63   :  { %333 = vmatprep.subr.mxu1 %v228_v48  ;;  %429 = vmatpush1.msra.mxu0 %v354_v7  ;;  %v116_v47 = vrot.slane %v107_v46, %v1237_v44  ;;  %v112_v48 = vrot.slane %v107_v46, %v1239_v45  ;;  %v517_v7 = vld [vmem:[#allocation2 + $0x2a8] sm:$0xff]  ;;  %v544_v46 = vld [vmem:[#allocation2 + $0x380] sm:$0xff] }
  0x64   :  { %334 = vmatpush2.msra.mxu1 %v227_v49  ;;  %430 = vmatprep.subr.mxu0 %v353_v8  ;;  %v516_v8 = vld [vmem:[#allocation2 + $0x2a0] sm:$0xff] }
  0x65   :  { %431 = vmatpush1.msra.mxu0 %v352_v9  ;;  %573 = vmatprep.subr.mxu1 %v527_v61  ;;  %v515_v9 = vld [vmem:[#allocation2 + $0x298] sm:$0xff] }
  0x66   :  { %432 = vmatprep.subr.mxu0 %v351_v10  ;;  %v514_v10 = vld [vmem:[#allocation2 + $0x290] sm:$0xff] }
  0x67   :  { %433 = vmatpush1.msra.mxu0 %v350_v11  ;;  %v513_v11 = vld [vmem:[#allocation2 + $0x288] sm:$0xff] }
  0x68   :  { %434 = vmatprep.subr.mxu0 %v349_v12  ;;  %v512_v12 = vld [vmem:[#allocation2 + $0x280] sm:$0xff] }
  0x69   :  { %435 = vmatpush1.msra.mxu0 %v348_v13  ;;  %v511_v13 = vld [vmem:[#allocation2 + $0x278] sm:$0xff] }
  0x6a   :  { %436 = vmatprep.subr.mxu0 %v347_v14  ;;  %v510_v14 = vld [vmem:[#allocation2 + $0x270] sm:$0xff] }
  0x6b   :  { %437 = vmatpush1.msra.mxu0 %v346_v15  ;;  %v509_v15 = vld [vmem:[#allocation2 + $0x268] sm:$0xff] }
  0x6c   :  { %438 = vmatprep.subr.mxu0 %v345_v16  ;;  %v508_v16 = vld [vmem:[#allocation2 + $0x260] sm:$0xff] }
  0x6d   :  { %439 = vmatpush1.msra.mxu0 %v344_v17  ;;  %v507_v17 = vld [vmem:[#allocation2 + $0x258] sm:$0xff] }
  0x6e   :  { %440 = vmatprep.subr.mxu0 %v407_v18  ;;  %v506_v18 = vld [vmem:[#allocation2 + $0x250] sm:$0xff] }
  0x6f   :  { %441 = vmatpush2.msra.mxu0 %v406_v20  ;;  %v505_v20 = vld [vmem:[#allocation2 + $0x248] sm:$0xff] }
  0x70   :  { %442 = vmatprep.subr.mxu0 %v405_v21  ;;  %v504_v21 = vld [vmem:[#allocation2 + $0x240] sm:$0xff] }
  0x71   :  { %443 = vmatpush2.msra.mxu0 %v404_v22  ;;  %v503_v22 = vld [vmem:[#allocation2 + $0x238] sm:$0xff] }
  0x72   :  { %444 = vmatprep.subr.mxu0 %v403_v23  ;;  %v502_v23 = vld [vmem:[#allocation2 + $0x230] sm:$0xff] }
  0x73   :  { %445 = vmatpush2.msra.mxu0 %v402_v24  ;;  %v501_v24 = vld [vmem:[#allocation2 + $0x228] sm:$0xff] }
  0x74   :  { %446 = vmatprep.subr.mxu0 %v401_v25  ;;  %v500_v25 = vld [vmem:[#allocation2 + $0x220] sm:$0xff] }
  0x75   :  { %447 = vmatpush2.msra.mxu0 %v400_v26  ;;  %v499_v26 = vld [vmem:[#allocation2 + $0x218] sm:$0xff] }
  0x76   :  { %448 = vmatprep.subr.mxu0 %v399_v27  ;;  %v498_v27 = vld [vmem:[#allocation2 + $0x210] sm:$0xff] }
  0x77   :  { %449 = vmatpush2.msra.mxu0 %v398_v28  ;;  %v497_v28 = vld [vmem:[#allocation2 + $0x208] sm:$0xff] }
  0x78   :  { %450 = vmatprep.subr.mxu0 %v397_v29  ;;  %v496_v29 = vld [vmem:[#allocation2 + $0x200] sm:$0xff] }
  0x79   :  { %451 = vmatpush2.msra.mxu0 %v396_v19  ;;  %v559_v19 = vld [vmem:[#allocation2 + $0x3f8] sm:$0xff] }
  0x7a   :  { %452 = vmatprep.subr.mxu0 %v395_v30  ;;  %v558_v30 = vld [vmem:[#allocation2 + $0x3f0] sm:$0xff] }
  0x7b   :  { %453 = vmatpush2.msra.mxu0 %v394_v31  ;;  %v557_v31 = vld [vmem:[#allocation2 + $0x3e8] sm:$0xff] }
  0x7c   :  { %454 = vmatprep.subr.mxu0 %v393_v32  ;;  %v556_v32 = vld [vmem:[#allocation2 + $0x3e0] sm:$0xff] }
  0x7d   :  { %455 = vmatpush2.msra.mxu0 %v392_v33  ;;  %v555_v33 = vld [vmem:[#allocation2 + $0x3d8] sm:$0xff] }
  0x7e   :  { %456 = vmatprep.subr.mxu0 %v391_v34  ;;  %v554_v34 = vld [vmem:[#allocation2 + $0x3d0] sm:$0xff] }
  0x7f   :  { %457 = vmatpush2.msra.mxu0 %v390_v35  ;;  %v553_v35 = vld [vmem:[#allocation2 + $0x3c8] sm:$0xff] }
  0x80   :  { %458 = vmatprep.subr.mxu0 %v389_v36  ;;  %v552_v36 = vld [vmem:[#allocation2 + $0x3c0] sm:$0xff] }
  0x81   :  { %459 = vmatpush2.msra.mxu0 %v388_v37  ;;  %v551_v37 = vld [vmem:[#allocation2 + $0x3b8] sm:$0xff] }
  0x82   :  { %460 = vmatprep.subr.mxu0 %v387_v38  ;;  %v550_v38 = vld [vmem:[#allocation2 + $0x3b0] sm:$0xff] }
  0x83   :  { %461 = vmatpush2.msra.mxu0 %v386_v39  ;;  %v549_v39 = vld [vmem:[#allocation2 + $0x3a8] sm:$0xff] }
  0x84   :  { %462 = vmatprep.subr.mxu0 %v385_v40  ;;  %v548_v40 = vld [vmem:[#allocation2 + $0x3a0] sm:$0xff] }
  0x85   :  { %463 = vmatpush2.msra.mxu0 %v384_v41  ;;  %v547_v41 = vld [vmem:[#allocation2 + $0x398] sm:$0xff] }
  0x86   :  { %464 = vmatprep.subr.mxu0 %v383_v53  ;;  %v539_v53 = vld [vmem:[#allocation2 + $0x358] sm:$0xff] }
  0x87   :  { %465 = vmatpush2.msra.mxu0 %v382_v54  ;;  %v538_v54 = vld [vmem:[#allocation2 + $0x350] sm:$0xff] }
  0x88   :  { %466 = vmatprep.subr.mxu0 %v381_v55  ;;  %v537_v55 = vld [vmem:[#allocation2 + $0x348] sm:$0xff] }
  0x89   :  { %467 = vmatpush2.msra.mxu0 %v380_v56  ;;  %v536_v56 = vld [vmem:[#allocation2 + $0x340] sm:$0xff] }
  0x8a   :  { %468 = vmatprep.subr.mxu0 %v379_v57  ;;  %v259_v57 = vld [vmem:[%s1385_s4] sm:$0x3] }
  0x8b   :  { %469 = vmatpush2.msra.mxu0 %v378_v58  ;;  %v264_v58 = vrot.slane %v259_v57, %v1239_v45 }
  0x8c   :  { %470 = vmatprep.subr.mxu0 %v377_v59  ;;  %v268_v59 = vrot.slane %v259_v57, %v1237_v44  ;;  %v699_v57 = vld [vmem:[#allocation5 + $0x3a0] sm:$0xff] }
  0x8d   :  { %471 = vmatpush2.msra.mxu0 %v376_v60 }
 0x10d   :  { %v190_v49 = vpop.f32.mrf.mxu0 }
 0x10e   :  { %v1248_v52 = vadd.f32 %v190_v49, %v112_v48  ;;  %v542_v48 = vld [vmem:[#allocation2 + $0x370] sm:$0xff]  ;;  %v541_v49 = vld [vmem:[#allocation2 + $0x368] sm:$0xff] }
 0x10f   :  { %v192_v50 = vpop.f32.mrf.mxu0 }
 0x110   :  { %v1246_v51 = vadd.f32 %v192_v50, %v116_v47  ;;  %v543_v47 = vld [vmem:[#allocation2 + $0x378] sm:$0xff]  ;;  %v540_v50 = vld [vmem:[#allocation2 + $0x360] sm:$0xff] }
 0x112   :  { %335 = vmatprep.mubr.f32.mxu1 %v1246_v51 }
 0x113   :  { %336 = vmatmul.mubr.f32.vlgmr.msra.gmra.mxu1 %v1248_v52 }
 0x114   :  { %574 = vmatpush1.msra.mxu1 %v526_v62 }
 0x115   :  { %575 = vmatprep.subr.mxu1 %v525_v63 }
 0x116   :  { %576 = vmatpush1.msra.mxu1 %v524_v0 }
 0x117   :  { %577 = vmatprep.subr.mxu1 %v523_v1 }
 0x118   :  { %578 = vmatpush1.msra.mxu1 %v522_v2  ;;  %v535_v2 = vld [vmem:[#allocation2 + $0x338] sm:$0xff] }
 0x119   :  { %579 = vmatprep.subr.mxu1 %v521_v3  ;;  %v534_v3 = vld [vmem:[#allocation2 + $0x330] sm:$0xff] }
 0x11a   :  { %580 = vmatpush1.msra.mxu1 %v520_v4  ;;  %v533_v4 = vld [vmem:[#allocation2 + $0x328] sm:$0xff] }
 0x11b   :  { %581 = vmatprep.subr.mxu1 %v519_v5  ;;  %v532_v5 = vld [vmem:[#allocation2 + $0x320] sm:$0xff] }
 0x11c   :  { %582 = vmatpush1.msra.mxu1 %v518_v6  ;;  %v531_v6 = vld [vmem:[#allocation2 + $0x318] sm:$0xff] }
 0x11d   :  { %583 = vmatprep.subr.mxu1 %v517_v7  ;;  %v530_v7 = vld [vmem:[#allocation2 + $0x310] sm:$0xff] }
 0x11e   :  { %584 = vmatpush1.msra.mxu1 %v516_v8  ;;  %v529_v8 = vld [vmem:[#allocation2 + $0x308] sm:$0xff] }
 0x11f   :  { %585 = vmatprep.subr.mxu1 %v515_v9  ;;  %v528_v9 = vld [vmem:[#allocation2 + $0x300] sm:$0xff] }
 0x120   :  { %586 = vmatpush1.msra.mxu1 %v514_v10  ;;  %v678_v10 = vld [vmem:[#allocation5 + $0x2f8] sm:$0xff] }
 0x121   :  { %587 = vmatprep.subr.mxu1 %v513_v11  ;;  %v677_v11 = vld [vmem:[#allocation5 + $0x2f0] sm:$0xff]  ;;  %711 = vmatprep.subr.mxu0 %v678_v10 }
 0x122   :  { %588 = vmatpush1.msra.mxu1 %v512_v12  ;;  %v676_v12 = vld [vmem:[#allocation5 + $0x2e8] sm:$0xff] }
 0x123   :  { %589 = vmatprep.subr.mxu1 %v511_v13  ;;  %v675_v13 = vld [vmem:[#allocation5 + $0x2e0] sm:$0xff] }
 0x124   :  { %590 = vmatpush1.msra.mxu1 %v510_v14  ;;  %v674_v14 = vld [vmem:[#allocation5 + $0x2d8] sm:$0xff] }
 0x125   :  { %591 = vmatprep.subr.mxu1 %v509_v15  ;;  %v673_v15 = vld [vmem:[#allocation5 + $0x2d0] sm:$0xff] }
 0x126   :  { %592 = vmatpush1.msra.mxu1 %v508_v16  ;;  %v672_v16 = vld [vmem:[#allocation5 + $0x2c8] sm:$0xff] }
 0x127   :  { %593 = vmatprep.subr.mxu1 %v507_v17  ;;  %v671_v17 = vld [vmem:[#allocation5 + $0x2c0] sm:$0xff] }
 0x128   :  { %594 = vmatpush1.msra.mxu1 %v506_v18  ;;  %v670_v18 = vld [vmem:[#allocation5 + $0x2b8] sm:$0xff] }
 0x129   :  { %595 = vmatprep.subr.mxu1 %v505_v20  ;;  %v669_v20 = vld [vmem:[#allocation5 + $0x2b0] sm:$0xff] }
 0x12a   :  { %596 = vmatpush1.msra.mxu1 %v504_v21  ;;  %v668_v21 = vld [vmem:[#allocation5 + $0x2a8] sm:$0xff] }
 0x12b   :  { %597 = vmatprep.subr.mxu1 %v503_v22  ;;  %v667_v22 = vld [vmem:[#allocation5 + $0x2a0] sm:$0xff] }
 0x12c   :  { %598 = vmatpush1.msra.mxu1 %v502_v23  ;;  %v666_v23 = vld [vmem:[#allocation5 + $0x298] sm:$0xff] }
 0x12d   :  { %599 = vmatprep.subr.mxu1 %v501_v24  ;;  %v665_v24 = vld [vmem:[#allocation5 + $0x290] sm:$0xff] }
 0x12e   :  { %600 = vmatpush1.msra.mxu1 %v500_v25  ;;  %v664_v25 = vld [vmem:[#allocation5 + $0x288] sm:$0xff] }
 0x12f   :  { %601 = vmatprep.subr.mxu1 %v499_v26  ;;  %v663_v26 = vld [vmem:[#allocation5 + $0x280] sm:$0xff] }
 0x130   :  { %602 = vmatpush1.msra.mxu1 %v498_v27  ;;  %v662_v27 = vld [vmem:[#allocation5 + $0x278] sm:$0xff] }
 0x131   :  { %603 = vmatprep.subr.mxu1 %v497_v28  ;;  %v661_v28 = vld [vmem:[#allocation5 + $0x270] sm:$0xff] }
 0x132   :  { %604 = vmatpush1.msra.mxu1 %v496_v29  ;;  %v660_v29 = vld [vmem:[#allocation5 + $0x268] sm:$0xff] }
 0x133   :  { %605 = vmatprep.subr.mxu1 %v559_v19  ;;  %v659_v19 = vld [vmem:[#allocation5 + $0x260] sm:$0xff] }
 0x134   :  { %606 = vmatpush2.msra.mxu1 %v558_v30  ;;  %v658_v30 = vld [vmem:[#allocation5 + $0x258] sm:$0xff] }
 0x135   :  { %607 = vmatprep.subr.mxu1 %v557_v31  ;;  %v657_v31 = vld [vmem:[#allocation5 + $0x250] sm:$0xff] }
 0x136   :  { %608 = vmatpush2.msra.mxu1 %v556_v32  ;;  %v656_v32 = vld [vmem:[#allocation5 + $0x248] sm:$0xff] }
 0x137   :  { %609 = vmatprep.subr.mxu1 %v555_v33  ;;  %v655_v33 = vld [vmem:[#allocation5 + $0x240] sm:$0xff] }
 0x138   :  { %610 = vmatpush2.msra.mxu1 %v554_v34  ;;  %v654_v34 = vld [vmem:[#allocation5 + $0x238] sm:$0xff] }
 0x139   :  { %611 = vmatprep.subr.mxu1 %v553_v35  ;;  %v653_v35 = vld [vmem:[#allocation5 + $0x230] sm:$0xff] }
 0x13a   :  { %612 = vmatpush2.msra.mxu1 %v552_v36  ;;  %v652_v36 = vld [vmem:[#allocation5 + $0x228] sm:$0xff] }
 0x13b   :  { %613 = vmatprep.subr.mxu1 %v551_v37  ;;  %v651_v37 = vld [vmem:[#allocation5 + $0x220] sm:$0xff] }
 0x13c   :  { %614 = vmatpush2.msra.mxu1 %v550_v38  ;;  %v650_v38 = vld [vmem:[#allocation5 + $0x218] sm:$0xff] }
 0x13d   :  { %615 = vmatprep.subr.mxu1 %v549_v39  ;;  %v649_v39 = vld [vmem:[#allocation5 + $0x210] sm:$0xff] }
 0x13e   :  { %616 = vmatpush2.msra.mxu1 %v548_v40  ;;  %v648_v40 = vld [vmem:[#allocation5 + $0x208] sm:$0xff] }
 0x13f   :  { %617 = vmatprep.subr.mxu1 %v547_v41  ;;  %v647_v41 = vld [vmem:[#allocation5 + $0x200] sm:$0xff] }
 0x140   :  { %618 = vmatpush2.msra.mxu1 %v546_v42  ;;  %v710_v42 = vld [vmem:[#allocation5 + $0x3f8] sm:$0xff] }
 0x141   :  { %619 = vmatprep.subr.mxu1 %v545_v43  ;;  %v709_v43 = vld [vmem:[#allocation5 + $0x3f0] sm:$0xff] }
 0x142   :  { %620 = vmatpush2.msra.mxu1 %v544_v46  ;;  %v708_v46 = vld [vmem:[#allocation5 + $0x3e8] sm:$0xff] }
 0x143   :  { %621 = vmatprep.subr.mxu1 %v543_v47  ;;  %v707_v47 = vld [vmem:[#allocation5 + $0x3e0] sm:$0xff] }
 0x144   :  { %622 = vmatpush2.msra.mxu1 %v542_v48  ;;  %v706_v48 = vld [vmem:[#allocation5 + $0x3d8] sm:$0xff] }
 0x145   :  { %623 = vmatprep.subr.mxu1 %v541_v49  ;;  %v705_v49 = vld [vmem:[#allocation5 + $0x3d0] sm:$0xff] }
 0x146   :  { %624 = vmatpush2.msra.mxu1 %v540_v50  ;;  %v704_v50 = vld [vmem:[#allocation5 + $0x3c8] sm:$0xff] }
 0x147   :  { %625 = vmatprep.subr.mxu1 %v539_v53  ;;  %v703_v53 = vld [vmem:[#allocation5 + $0x3c0] sm:$0xff] }
 0x148   :  { %626 = vmatpush2.msra.mxu1 %v538_v54  ;;  %v702_v54 = vld [vmem:[#allocation5 + $0x3b8] sm:$0xff] }
 0x149   :  { %627 = vmatprep.subr.mxu1 %v537_v55  ;;  %v701_v55 = vld [vmem:[#allocation5 + $0x3b0] sm:$0xff] }
 0x14a   :  { %628 = vmatpush2.msra.mxu1 %v536_v56  ;;  %v700_v56 = vld [vmem:[#allocation5 + $0x3a8] sm:$0xff] }
 0x14b   :  { %629 = vmatprep.subr.mxu1 %v535_v2  ;;  %v690_v2 = vld [vmem:[#allocation5 + $0x358] sm:$0xff] }
 0x14c   :  { %630 = vmatpush2.msra.mxu1 %v534_v3  ;;  %v689_v3 = vld [vmem:[#allocation5 + $0x350] sm:$0xff] }
 0x14d   :  { %631 = vmatprep.subr.mxu1 %v533_v4  ;;  %v688_v4 = vld [vmem:[#allocation5 + $0x348] sm:$0xff] }
 0x14e   :  { %632 = vmatpush2.msra.mxu1 %v532_v5  ;;  %v687_v5 = vld [vmem:[#allocation5 + $0x340] sm:$0xff] }
 0x14f   :  { %633 = vmatprep.subr.mxu1 %v531_v6  ;;  %v481_v6 = vld [vmem:[%s1387_s6] sm:$0x3] }
 0x150   :  { %634 = vmatpush2.msra.mxu1 %v530_v7  ;;  %v486_v10 = vrot.slane %v481_v6, %v1239_v45 }
 0x151   :  { %635 = vmatprep.subr.mxu1 %v529_v8  ;;  %v490_v8 = vrot.slane %v481_v6, %v1237_v44 }
 0x152   :  { %636 = vmatpush2.msra.mxu1 %v528_v9 }
 0x1d3   :  { %v337_v60 = vpop.f32.mrf.mxu1 }
 0x1d4   :  { %v338_v61 = vadd.f32 %v337_v60, %v264_v58  ;;  %v698_v58 = vld [vmem:[#allocation5 + $0x398] sm:$0xff]  ;;  %v696_v60 = vld [vmem:[#allocation5 + $0x388] sm:$0xff] }
 0x1d5   :  { %v339_v62 = vpop.f32.mrf.mxu1 }
 0x1d6   :  { %v340_v63 = vadd.f32 %v339_v62, %v268_v59  ;;  %v342_v1 = vmax.f32 %v338_v61, 0.0  ;;  %v697_v59 = vld [vmem:[#allocation5 + $0x390] sm:$0xff]  ;;  %v695_v61 = vld [vmem:[#allocation5 + $0x380] sm:$0xff]  ;;  %v694_v62 = vld [vmem:[#allocation5 + $0x378] sm:$0xff] }
 0x1d8   :  { %v343_v0 = vmax.f32 %v340_v63, 0.0  ;;  %v693_v63 = vld [vmem:[#allocation5 + $0x370] sm:$0xff] }
 0x1da   :  { %472 = vmatprep.mubr.f32.mxu0 %v343_v0  ;;  %v692_v0 = vld [vmem:[#allocation5 + $0x368] sm:$0xff] }
 0x1db   :  { %473 = vmatmul.mubr.f32.vlgmr.msra.gmra.mxu0 %v342_v1  ;;  %v691_v1 = vld [vmem:[#allocation5 + $0x360] sm:$0xff] }
 0x1dc   :  { %712 = vmatpush1.msra.mxu0 %v677_v11 }
 0x1dd   :  { %713 = vmatprep.subr.mxu0 %v676_v12 }
 0x1de   :  { %714 = vmatpush1.msra.mxu0 %v675_v13 }
 0x1df   :  { %715 = vmatprep.subr.mxu0 %v674_v14 }
 0x1e0   :  { %716 = vmatpush1.msra.mxu0 %v673_v15  ;;  %v686_v15 = vld [vmem:[#allocation5 + $0x338] sm:$0xff] }
 0x1e1   :  { %717 = vmatprep.subr.mxu0 %v672_v16  ;;  %v685_v16 = vld [vmem:[#allocation5 + $0x330] sm:$0xff] }
 0x1e2   :  { %718 = vmatpush1.msra.mxu0 %v671_v17  ;;  %v684_v17 = vld [vmem:[#allocation5 + $0x328] sm:$0xff] }
 0x1e3   :  { %719 = vmatprep.subr.mxu0 %v670_v18  ;;  %v682_v18 = vld [vmem:[#allocation5 + $0x318] sm:$0xff] }
 0x1e4   :  { %720 = vmatpush1.msra.mxu0 %v669_v20  ;;  %v681_v20 = vld [vmem:[#allocation5 + $0x310] sm:$0xff] }
 0x1e5   :  { %721 = vmatprep.subr.mxu0 %v668_v21  ;;  %v679_v21 = vld [vmem:[#allocation5 + $0x300] sm:$0xff] }
 0x1e6   :  { %722 = vmatpush1.msra.mxu0 %v667_v22  ;;  %v830_v22 = vld [vmem:[%s1388_s7 + $0xf8] sm:$0xff] }
 0x1e7   :  { %723 = vmatprep.subr.mxu0 %v666_v23  ;;  %v814_v23 = vld [vmem:[%s1388_s7 + $0x78] sm:$0xff]  ;;  %922 = vmatprep.subr.mxu1 %v830_v22 }
 0x1e8   :  { %724 = vmatpush1.msra.mxu0 %v665_v24  ;;  %v829_v24 = vld [vmem:[%s1388_s7 + $0xf0] sm:$0xff] }
 0x1e9   :  { %725 = vmatprep.subr.mxu0 %v664_v25  ;;  %v813_v25 = vld [vmem:[%s1388_s7 + $0x70] sm:$0xff] }
 0x1ea   :  { %726 = vmatpush1.msra.mxu0 %v663_v26  ;;  %v828_v26 = vld [vmem:[%s1388_s7 + $0xe8] sm:$0xff] }
 0x1eb   :  { %727 = vmatprep.subr.mxu0 %v662_v27  ;;  %v812_v27 = vld [vmem:[%s1388_s7 + $0x68] sm:$0xff] }
 0x1ec   :  { %728 = vmatpush1.msra.mxu0 %v661_v28  ;;  %v827_v28 = vld [vmem:[%s1388_s7 + $0xe0] sm:$0xff] }
 0x1ed   :  { %729 = vmatprep.subr.mxu0 %v660_v29  ;;  %v811_v29 = vld [vmem:[%s1388_s7 + $0x60] sm:$0xff] }
 0x1ee   :  { %730 = vmatpush1.msra.mxu0 %v659_v19  ;;  %v826_v19 = vld [vmem:[%s1388_s7 + $0xd8] sm:$0xff] }
 0x1ef   :  { %731 = vmatprep.subr.mxu0 %v658_v30  ;;  %v810_v30 = vld [vmem:[%s1388_s7 + $0x58] sm:$0xff] }
 0x1f0   :  { %732 = vmatpush1.msra.mxu0 %v657_v31  ;;  %v825_v31 = vld [vmem:[%s1388_s7 + $0xd0] sm:$0xff] }
 0x1f1   :  { %733 = vmatprep.subr.mxu0 %v656_v32  ;;  %v809_v32 = vld [vmem:[%s1388_s7 + $0x50] sm:$0xff] }
 0x1f2   :  { %734 = vmatpush1.msra.mxu0 %v655_v33  ;;  %v824_v33 = vld [vmem:[%s1388_s7 + $0xc8] sm:$0xff] }
 0x1f3   :  { %735 = vmatprep.subr.mxu0 %v654_v34  ;;  %v808_v34 = vld [vmem:[%s1388_s7 + $0x48] sm:$0xff] }
 0x1f4   :  { %736 = vmatpush1.msra.mxu0 %v653_v35  ;;  %v823_v35 = vld [vmem:[%s1388_s7 + $0xc0] sm:$0xff] }
 0x1f5   :  { %737 = vmatprep.subr.mxu0 %v652_v36  ;;  %v807_v36 = vld [vmem:[%s1388_s7 + $0x40] sm:$0xff] }
 0x1f6   :  { %738 = vmatpush1.msra.mxu0 %v651_v37  ;;  %v822_v37 = vld [vmem:[%s1388_s7 + $0xb8] sm:$0xff] }
 0x1f7   :  { %739 = vmatprep.subr.mxu0 %v650_v38  ;;  %v806_v38 = vld [vmem:[%s1388_s7 + $0x38] sm:$0xff] }
 0x1f8   :  { %740 = vmatpush1.msra.mxu0 %v649_v39  ;;  %v821_v39 = vld [vmem:[%s1388_s7 + $0xb0] sm:$0xff] }
 0x1f9   :  { %741 = vmatprep.subr.mxu0 %v648_v40  ;;  %v805_v40 = vld [vmem:[%s1388_s7 + $0x30] sm:$0xff] }
 0x1fa   :  { %742 = vmatpush1.msra.mxu0 %v647_v41  ;;  %v820_v41 = vld [vmem:[%s1388_s7 + $0xa8] sm:$0xff] }
 0x1fb   :  { %743 = vmatprep.subr.mxu0 %v710_v42  ;;  %v804_v42 = vld [vmem:[%s1388_s7 + $0x28] sm:$0xff] }
 0x1fc   :  { %744 = vmatpush2.msra.mxu0 %v709_v43  ;;  %v819_v43 = vld [vmem:[%s1388_s7 + $0xa0] sm:$0xff] }
 0x1fd   :  { %745 = vmatprep.subr.mxu0 %v708_v46  ;;  %v803_v46 = vld [vmem:[%s1388_s7 + $0x20] sm:$0xff] }
 0x1fe   :  { %746 = vmatpush2.msra.mxu0 %v707_v47  ;;  %v920_v47 = vld [vmem:[%s1385_s4 + $0x2] sm:$0x3] }
 0x1ff   :  { %747 = vmatprep.subr.mxu0 %v706_v48  ;;  %v566_v48 = vrot.slane %v920_v47, %v1239_v45 }
 0x200   :  { %748 = vmatpush2.msra.mxu0 %v705_v49  ;;  %v570_v49 = vrot.slane %v920_v47, %v1237_v44 }
 0x201   :  { %749 = vmatprep.subr.mxu0 %v704_v50 }
 0x202   :  { %750 = vmatpush2.msra.mxu0 %v703_v53 }
 0x203   :  { %751 = vmatprep.subr.mxu0 %v702_v54 }
 0x204   :  { %752 = vmatpush2.msra.mxu0 %v701_v55 }
 0x205   :  { %753 = vmatprep.subr.mxu0 %v700_v56 }
 0x206   :  { %754 = vmatpush2.msra.mxu0 %v699_v57 }
 0x207   :  { %755 = vmatprep.subr.mxu0 %v698_v58  ;;  %v818_v58 = vld [vmem:[%s1388_s7 + $0x98] sm:$0xff] }
 0x208   :  { %756 = vmatpush2.msra.mxu0 %v697_v59  ;;  %v802_v59 = vld [vmem:[%s1388_s7 + $0x18] sm:$0xff] }
 0x209   :  { %757 = vmatprep.subr.mxu0 %v696_v60  ;;  %v817_v60 = vld [vmem:[%s1388_s7 + $0x90] sm:$0xff] }
 0x20a   :  { %758 = vmatpush2.msra.mxu0 %v695_v61  ;;  %v801_v61 = vld [vmem:[%s1388_s7 + $0x10] sm:$0xff] }
 0x20b   :  { %759 = vmatprep.subr.mxu0 %v694_v62  ;;  %v816_v62 = vld [vmem:[%s1388_s7 + $0x88] sm:$0xff] }
 0x20c   :  { %760 = vmatpush2.msra.mxu0 %v693_v63  ;;  %v800_v63 = vld [vmem:[%s1388_s7 + $0x8] sm:$0xff] }
 0x20d   :  { %761 = vmatprep.subr.mxu0 %v692_v0  ;;  %v815_v0 = vld [vmem:[%s1388_s7 + $0x80] sm:$0xff] }
 0x20e   :  { %762 = vmatpush2.msra.mxu0 %v691_v1  ;;  %v799_v1 = vld [vmem:[%s1388_s7] sm:$0xff]  ;;  %s1033_s7 = smov [#allocation7]  }
 0x20f   :  { %763 = vmatprep.subr.mxu0 %v690_v2  ;;  %v921_v2 = vld [vmem:[%s1387_s6 + $0x2] sm:$0x3]  ;;  %s909_s9 = sshll.u32 %s1033_s7, 4  ;;  %s910_s9 = int_to_ptr.vmem [resolvable:$true] %s909_s9 }
 0x210   :  { %764 = vmatpush2.msra.mxu0 %v689_v3  ;;  %v790_v6 = vrot.slane %v921_v2, %v1239_v45  ;;  %s1003_s6 = scalar_lea.vmem %s910_s9, 64  ;;  %p1008_p11 = scmp.lt.s32.totalorder %s910_s9, %s910_s9 }
 0x211   :  { %765 = vmatprep.subr.mxu0 %v688_v4  ;;  %v794_v4 = vrot.slane %v921_v2, %v1237_v44  ;;  %p1004_p10 = scmp.ne.s32.totalorder %s910_s9, %s1003_s6  ;;  %p1009_p12 = scmp.lt.s32.totalorder %s1003_s6, %s1003_s6 }
 0x212   :  { %766 = vmatpush2.msra.mxu0 %v687_v5 }
 0x213   :  { %767 = vmatprep.subr.mxu0 %v686_v15  ;;  %p1010_p13 = por %p1009_p12, %p1008_p11 }
 0x214   :  { %768 = vmatpush2.msra.mxu0 %v685_v16 }
 0x215   :  { %769 = vmatprep.subr.mxu0 %v684_v17  ;;  %p1011_p0 = pnand %p1010_p13, %p1004_p10 }
 0x29b   :  { %v474_v7 = vpop.f32.mrf.mxu0 }
 0x29c   :  { %v479_v9 = vadd.f32 %v474_v7, %v1248_v52  ;;  %v683_v52 = vld [vmem:[#allocation5 + $0x320] sm:$0xff] }
 0x29d   :  { %v476_v11 = vpop.f32.mrf.mxu0  ;;  %770 = vmatpush2.msra.mxu0 %v683_v52 }
 0x29e   :  { %v480_v12 = vadd.f32 %v476_v11, %v1246_v51  ;;  %v1266_v14 = vadd.f32 %v486_v10, %v479_v9  ;;  %771 = vmatprep.subr.mxu0 %v682_v18  ;;  %v680_v51 = vld [vmem:[#allocation5 + $0x308] sm:$0xff] }
 0x29f   :  { %772 = vmatpush2.msra.mxu0 %v681_v20 }
 0x2a0   :  { %v1264_v13 = vadd.f32 %v490_v8, %v480_v12  ;;  %773 = vmatprep.subr.mxu0 %v680_v51 }
 0x2a1   :  { %774 = vmatpush2.msra.mxu0 %v679_v21 }
 0x2a2   :  { %637 = vmatprep.mubr.f32.mxu1 %v1264_v13 }
 0x2a3   :  { %638 = vmatmul.mubr.f32.vlgmr.msra.gmra.mxu1 %v1266_v14 }
 0x2a4   :  { %923 = vmatpush3.msra.mxu1 %v814_v23 }
 0x2a5   :  { %924 = vmatprep.subr.mxu1 %v829_v24 }
 0x2a6   :  { %925 = vmatpush3.msra.mxu1 %v813_v25 }
 0x2a7   :  { %926 = vmatprep.subr.mxu1 %v828_v26 }
 0x2a8   :  { %927 = vmatpush3.msra.mxu1 %v812_v27 }
 0x2a9   :  { %928 = vmatprep.subr.mxu1 %v827_v28 }
 0x2aa   :  { %929 = vmatpush3.msra.mxu1 %v811_v29 }
 0x2ab   :  { %930 = vmatprep.subr.mxu1 %v826_v19 }
 0x2ac   :  { %931 = vmatpush3.msra.mxu1 %v810_v30 }
 0x2ad   :  { %932 = vmatprep.subr.mxu1 %v825_v31 }
 0x2ae   :  { %933 = vmatpush3.msra.mxu1 %v809_v32 }
 0x2af   :  { %934 = vmatprep.subr.mxu1 %v824_v33 }
 0x2b0   :  { %935 = vmatpush3.msra.mxu1 %v808_v34 }
 0x2b1   :  { %936 = vmatprep.subr.mxu1 %v823_v35 }
 0x2b2   :  { %937 = vmatpush3.msra.mxu1 %v807_v36 }
 0x2b3   :  { %938 = vmatprep.subr.mxu1 %v822_v37 }
 0x2b4   :  { %939 = vmatpush3.msra.mxu1 %v806_v38 }
 0x2b5   :  { %940 = vmatprep.subr.mxu1 %v821_v39 }
 0x2b6   :  { %941 = vmatpush3.msra.mxu1 %v805_v40 }
 0x2b7   :  { %942 = vmatprep.subr.mxu1 %v820_v41 }
 0x2b8   :  { %943 = vmatpush3.msra.mxu1 %v804_v42 }
 0x2b9   :  { %944 = vmatprep.subr.mxu1 %v819_v43 }
 0x2ba   :  { %945 = vmatpush3.msra.mxu1 %v803_v46 }
 0x2bb   :  { %946 = vmatprep.subr.mxu1 %v818_v58 }
 0x2bc   :  { %947 = vmatpush3.msra.mxu1 %v802_v59 }
 0x2bd   :  { %948 = vmatprep.subr.mxu1 %v817_v60 }
 0x2be   :  { %949 = vmatpush3.msra.mxu1 %v801_v61 }
 0x2bf   :  { %950 = vmatprep.subr.mxu1 %v816_v62 }
 0x2c0   :  { %951 = vmatpush3.msra.mxu1 %v800_v63 }
 0x2c1   :  { %952 = vmatprep.subr.mxu1 %v815_v0 }
 0x2c2   :  { %953 = vmatpush3.msra.mxu1 %v799_v1 }
 0x363   :  { %v639_v50 = vpop.f32.mrf.mxu1 }
 0x364   :  { %v640_v53 = vadd.f32 %v639_v50, %v566_v48 }
 0x365   :  { %v641_v54 = vpop.f32.mrf.mxu1 }
 0x366   :  { %v642_v55 = vadd.f32 %v641_v54, %v570_v49  ;;  %v644_v57 = vmax.f32 %v640_v53, 0.0 }
 0x368   :  { %v645_v56 = vmax.f32 %v642_v55, 0.0 }
 0x36a   :  { %775 = vmatprep.mubr.f32.mxu0 %v645_v56 }
 0x36b   :  { %776 = vmatmul.mubr.f32.vlgmr.msra.gmra.mxu0 %v644_v57 }
 0x42b   :  { %v777_v3 = vpop.f32.mrf.mxu0 }
 0x42c   :  { %v782_v5 = vadd.f32 %v777_v3, %v1266_v14 }
 0x42d   :  { %v779_v7 = vpop.f32.mrf.mxu0 }
 0x42e   :  { %v783_v8 = vadd.f32 %v779_v7, %v1264_v13  ;;  %v797_v10 = vadd.f32 %v790_v6, %v782_v5 }
 0x430   :  { %v798_v9 = vadd.f32 %v794_v4, %v783_v8 }
 0x432   :  { %895 = vmatprep.mubr.f32.mxu1 %v798_v9 }
 0x433   :  { %896 = vmatmul.mubr.f32.vlgmr.msra.gmra.mxu1 %v797_v10 }
 0x4f3   :  { %v954_v11 = vpop.f32.mrf.mxu1 }
 0x4f5   :  { %v955_v12 = vpop.f32.mrf.mxu1 }
 0x4f6   :  { %v956_v15 = vadd.f32 %v955_v12, %v954_v11 }
 0x4f8   :  { %902 = vst.msk [vmem:[#allocation7] sm:$0xf] %vm901_vm1, %v956_v15 }
 0x4f9   :  { %1014 = shalt.err (!%p1011_p0)
}
 0x4fa   :  { %912 = dma.vmem_to_hbm [thread:$0]  %s910_s9, 64, %s1389_s8, [#allocation4]  }
 0x4fb   :  { %1027 = dma.done.wait [#allocation4], 64  }
 0x4fc   :  { %1028 = vsyncadd [#allocation4], 4294967232 }
 0x4fd   :  { %916 = vsyncpa [#allocation3], 1 }
 0x4fe   :  { %917 = vsyncpa [#allocation6], 1 }
 0x4ff   :  { %918 = vsyncpa [#allocation4], 1 }

</bundles_post_ra>
